<compile_context>
chip_gen: v7x
topology: tpu7x:2x2x1
jax: 0.10.0
libtpu: 0.0.40
codegen_flags: <defaults>
</compile_context>

<pallas_src>
import jax
import jax.numpy as jnp
from jax.experimental import pallas as pl
from jax.experimental.pallas import tpu as pltpu


def _se_kernel(x_ref, w1_ref, b1_ref, w2_ref, b2_ref, o_ref):
    # x_ref : (bn, C, HW)  bn samples; channels on sublanes, spatial on lanes
    # w1_ref: (C_mid, C)   fc1 weight (1x1 conv == dense over channels)
    # b1_ref: (C_mid, 1)
    # w2_ref: (C, C_mid)   fc2 weight
    # b2_ref: (C, 1)
    # o_ref : (bn, C, HW)
    bn = x_ref.shape[0]
    hw = x_ref.shape[-1]
    inv_hw = 1.0 / hw

    # Global average pool over the spatial (lane) axis via MXU ones-dots:
    # f32 accumulation without materializing an f32 copy of the hot tile.
    ones = jnp.ones((hw, 1), dtype=x_ref.dtype)
    cols = [
        jnp.dot(x_ref[i], ones, preferred_element_type=jnp.float32)  # (C, 1) f32
        for i in range(bn)
    ]
    pooled = (jnp.concatenate(cols, axis=1) if bn > 1 else cols[0]) * inv_hw  # (C, bn)

    # fc1 (1x1 conv) + ReLU for all bn samples: (C_mid, C) @ (C, bn) -> (C_mid, bn)
    h = jnp.dot(w1_ref[...], pooled,
                preferred_element_type=jnp.float32) + b1_ref[...]
    h = jnp.maximum(h, 0.0)

    # fc2 (1x1 conv) + sigmoid: (C, C_mid) @ (C_mid, bn) -> (C, bn)
    s = jax.nn.sigmoid(
        jnp.dot(w2_ref[...], h, preferred_element_type=jnp.float32) + b2_ref[...])

    # Scale in the input dtype; each (C, 1) gate broadcasts across the HW lanes.
    for i in range(bn):
        gate = s[:, i:i + 1].astype(x_ref.dtype)
        o_ref[i] = x_ref[i] * gate


def se_pallas(x_nchw, w1, b1, w2, b2):
    """x_nchw: (N, C, H, W); w1: (C_mid, C); b1: (C_mid,); w2: (C, C_mid); b2: (C,)."""
    N, C, H, W = x_nchw.shape
    C_mid = w1.shape[0]
    HW = H * W
    itemsize = jnp.dtype(x_nchw.dtype).itemsize

    # Pack bn samples per grid step: largest divisor of N whose input block
    # fits an ~8 MiB budget (amortizes per-step overhead on small maps while
    # keeping 1 sample / step + grid parallelism for production sizes).
    per_sample_bytes = C * HW * itemsize
    block_budget = 8 << 20
    bn = 1
    for d in range(N, 0, -1):
        if N % d == 0 and d * per_sample_bytes <= block_budget:
            bn = d
            break

    # Free (no data movement) reshapes.
    x_flat = x_nchw.reshape(N, C, HW)
    b1_2d = b1.reshape(C_mid, 1)
    b2_2d = b2.reshape(C, 1)

    # Explicit VMEM budget: in + out blocks (double-buffered) + params + slack,
    # clamped under the v7x 64 MiB physical ceiling.
    blk_bytes = bn * per_sample_bytes
    param_bytes = (w1.size + w2.size + b1.size + b2.size) * jnp.dtype(w1.dtype).itemsize
    needed = 4 * blk_bytes + 2 * param_bytes + (2 << 20)
    vmem_limit = int(min(max(needed, 4 << 20), 48 << 20))

    out_flat = pl.pallas_call(
        _se_kernel,
        out_shape=jax.ShapeDtypeStruct((N, C, HW), x_nchw.dtype),
        grid_spec=pltpu.PrefetchScalarGridSpec(
            num_scalar_prefetch=0,
            grid=(N // bn,),
            in_specs=[
                pl.BlockSpec((bn, C, HW), lambda n: (n, 0, 0)),
                pl.BlockSpec((C_mid, C), lambda n: (0, 0)),
                pl.BlockSpec((C_mid, 1), lambda n: (0, 0)),
                pl.BlockSpec((C, C_mid), lambda n: (0, 0)),
                pl.BlockSpec((C, 1), lambda n: (0, 0)),
            ],
            out_specs=pl.BlockSpec((bn, C, HW), lambda n: (n, 0, 0)),
        ),
        compiler_params=pltpu.CompilerParams(
            dimension_semantics=("parallel",),
            vmem_limit_bytes=vmem_limit,
        ),
    )(x_flat, w1, b1_2d, w2, b2_2d)

    # Free reshape back to NCHW (no transpose).
    return out_flat.reshape(N, C, H, W)


def se_reference(x_nchw, w1, b1, w2, b2):
    """Pure-JAX reference matching the PyTorch forward exactly."""
    pooled = jnp.mean(x_nchw, axis=(2, 3))                    # (N, C)
    h = jnp.maximum(pooled @ w1.T + b1, 0.0)                  # (N, C_mid)
    s = jax.nn.sigmoid(h @ w2.T + b2)                         # (N, C)
    return x_nchw * s[:, :, None, None]


if __name__ == "__main__":
    # Small shapes consistent with the module: channels=4, reduction=1.
    N, C, H, W = 2, 4, 16, 16
    reduction = 1
    C_mid = C // reduction

    key = jax.random.PRNGKey(0)
    kx, kw1, kb1, kw2, kb2 = jax.random.split(key, 5)

    x = jax.random.normal(kx, (N, C, H, W), dtype=jnp.float32)
    # Deterministic synthetic parameters (Conv2d 1x1 weights squeezed to 2D).
    w1 = 0.1 * jax.random.normal(kw1, (C_mid, C), dtype=jnp.float32)
    b1 = 0.1 * jax.random.normal(kb1, (C_mid,), dtype=jnp.float32)
    w2 = 0.1 * jax.random.normal(kw2, (C, C_mid), dtype=jnp.float32)
    b2 = 0.1 * jax.random.normal(kb2, (C,), dtype=jnp.float32)

    out = se_pallas(x, w1, b1, w2, b2)
    jax.block_until_ready(out)

    ref = se_reference(x, w1, b1, w2, b2)
    assert out.shape == (N, C, H, W)
    assert jnp.allclose(out, ref, atol=1e-5, rtol=1e-5), "mismatch vs reference"

    print("KERNEL_OK")
</pallas_src>

<mosaic_0001>
module attributes {stable_mosaic.version = 11 : i64} {
  func.func @_se_kernel(%arg0: i32, %arg1: memref<2x4x256xf32, #tpu.memory_space<vmem>>, %arg2: memref<4x4xf32, #tpu.memory_space<vmem>>, %arg3: memref<4x1xf32, #tpu.memory_space<vmem>>, %arg4: memref<4x4xf32, #tpu.memory_space<vmem>>, %arg5: memref<4x1xf32, #tpu.memory_space<vmem>>, %arg6: memref<2x4x256xf32, #tpu.memory_space<vmem>>) attributes {dimension_semantics = [#tpu.dimension_semantics<parallel>], iteration_bounds = array<i64: 1>, scalar_prefetch = 0 : i64, scratch_operands = 0 : i64, tpu.core_type = #tpu.core_type<tc>, window_params = [{transform_indices = @transform_0, window_bounds = array<i64: 2, 4, 256>}, {pipeline_mode = #tpu.pipeline_mode<synchronous>, transform_indices = @transform_1, window_bounds = array<i64: 4, 4>}, {pipeline_mode = #tpu.pipeline_mode<synchronous>, transform_indices = @transform_2, window_bounds = array<i64: 4, 1>}, {pipeline_mode = #tpu.pipeline_mode<synchronous>, transform_indices = @transform_3, window_bounds = array<i64: 4, 4>}, {pipeline_mode = #tpu.pipeline_mode<synchronous>, transform_indices = @transform_4, window_bounds = array<i64: 4, 1>}, {transform_indices = @transform_5, window_bounds = array<i64: 2, 4, 256>}]} {
    %cst = arith.constant 1.000000e+00 : f32
    %0 = vector.broadcast %cst : f32 to vector<256x1xf32>
    %c0 = arith.constant 0 : index
    %c0_0 = arith.constant 0 : index
    %c0_1 = arith.constant 0 : index
    %1 = vector.load %arg1[%c0, %c0_0, %c0_1] : memref<2x4x256xf32, #tpu.memory_space<vmem>>, vector<1x4x256xf32>
    %2 = vector.shape_cast %1 : vector<1x4x256xf32> to vector<4x256xf32>
    %cst_2 = arith.constant dense<0.000000e+00> : vector<4x1xf32>
    %3 = tpu.matmul %2, %0, %cst_2 {dimension_numbers = #tpu.dot_dimension_numbers<[1], [0], [0], [1], [0, 0, 1, 1], [], []>} : vector<4x256xf32>, vector<256x1xf32>, vector<4x1xf32> -> vector<4x1xf32>
    %c1 = arith.constant 1 : index
    %c0_3 = arith.constant 0 : index
    %c0_4 = arith.constant 0 : index
    %4 = vector.load %arg1[%c1, %c0_3, %c0_4] : memref<2x4x256xf32, #tpu.memory_space<vmem>>, vector<1x4x256xf32>
    %5 = vector.shape_cast %4 : vector<1x4x256xf32> to vector<4x256xf32>
    %cst_5 = arith.constant dense<0.000000e+00> : vector<4x1xf32>
    %6 = tpu.matmul %5, %0, %cst_5 {dimension_numbers = #tpu.dot_dimension_numbers<[1], [0], [0], [1], [0, 0, 1, 1], [], []>} : vector<4x256xf32>, vector<256x1xf32>, vector<4x1xf32> -> vector<4x1xf32>
    %7 = tpu.concatenate %3, %6 in 1 : vector<4x1xf32>, vector<4x1xf32> -> vector<4x2xf32>
    %cst_6 = arith.constant 3.906250e-03 : f32
    %8 = vector.broadcast %cst_6 : f32 to vector<4x2xf32>
    %9 = arith.mulf %7, %8 : vector<4x2xf32>
    %c0_7 = arith.constant 0 : index
    %c0_8 = arith.constant 0 : index
    %10 = vector.load %arg2[%c0_7, %c0_8] : memref<4x4xf32, #tpu.memory_space<vmem>>, vector<4x4xf32>
    %cst_9 = arith.constant dense<0.000000e+00> : vector<4x2xf32>
    %11 = tpu.matmul %10, %9, %cst_9 {dimension_numbers = #tpu.dot_dimension_numbers<[1], [0], [0], [1], [0, 0, 1, 1], [], []>} : vector<4x4xf32>, vector<4x2xf32>, vector<4x2xf32> -> vector<4x2xf32>
    %c0_10 = arith.constant 0 : index
    %c0_11 = arith.constant 0 : index
    %12 = vector.load %arg3[%c0_10, %c0_11] : memref<4x1xf32, #tpu.memory_space<vmem>>, vector<4x1xf32>
    %13 = vector.broadcast %12 : vector<4x1xf32> to vector<4x2xf32>
    %14 = arith.addf %11, %13 : vector<4x2xf32>
    %cst_12 = arith.constant 0.000000e+00 : f32
    %15 = vector.broadcast %cst_12 : f32 to vector<4x2xf32>
    %16 = arith.maximumf %14, %15 : vector<4x2xf32>
    %c0_13 = arith.constant 0 : index
    %c0_14 = arith.constant 0 : index
    %17 = vector.load %arg4[%c0_13, %c0_14] : memref<4x4xf32, #tpu.memory_space<vmem>>, vector<4x4xf32>
    %cst_15 = arith.constant dense<0.000000e+00> : vector<4x2xf32>
    %18 = tpu.matmul %17, %16, %cst_15 {dimension_numbers = #tpu.dot_dimension_numbers<[1], [0], [0], [1], [0, 0, 1, 1], [], []>} : vector<4x4xf32>, vector<4x2xf32>, vector<4x2xf32> -> vector<4x2xf32>
    %c0_16 = arith.constant 0 : index
    %c0_17 = arith.constant 0 : index
    %19 = vector.load %arg5[%c0_16, %c0_17] : memref<4x1xf32, #tpu.memory_space<vmem>>, vector<4x1xf32>
    %20 = vector.broadcast %19 : vector<4x1xf32> to vector<4x2xf32>
    %21 = arith.addf %18, %20 : vector<4x2xf32>
    %22 = arith.negf %21 : vector<4x2xf32>
    %23 = math.exp %22 : vector<4x2xf32>
    %cst_18 = arith.constant 1.000000e+00 : f32
    %24 = vector.broadcast %cst_18 : f32 to vector<4x2xf32>
    %25 = arith.addf %24, %23 : vector<4x2xf32>
    %26 = arith.divf %24, %25 : vector<4x2xf32>
    %27 = vector.extract_strided_slice %26 {offsets = [0, 0], sizes = [4, 1], strides = [1, 1]} : vector<4x2xf32> to vector<4x1xf32>
    %c0_19 = arith.constant 0 : index
    %c0_20 = arith.constant 0 : index
    %c0_21 = arith.constant 0 : index
    %28 = vector.load %arg1[%c0_19, %c0_20, %c0_21] : memref<2x4x256xf32, #tpu.memory_space<vmem>>, vector<1x4x256xf32>
    %29 = vector.shape_cast %28 : vector<1x4x256xf32> to vector<4x256xf32>
    %30 = vector.broadcast %27 : vector<4x1xf32> to vector<4x256xf32>
    %31 = arith.mulf %29, %30 : vector<4x256xf32>
    %c0_22 = arith.constant 0 : index
    %c0_23 = arith.constant 0 : index
    %c0_24 = arith.constant 0 : index
    %32 = vector.load %arg6[%c0_22, %c0_23, %c0_24] : memref<2x4x256xf32, #tpu.memory_space<vmem>>, vector<1x4x256xf32>
    %33 = vector.shape_cast %32 : vector<1x4x256xf32> to vector<4x256xf32>
    %34 = vector.shape_cast %31 : vector<4x256xf32> to vector<1x4x256xf32>
    tpu.vector_store %arg6[%c0_22, %c0_23, %c0_24], %34 {strides = array<i32>} : memref<2x4x256xf32, #tpu.memory_space<vmem>>, vector<1x4x256xf32>,
    %35 = vector.extract_strided_slice %26 {offsets = [0, 1], sizes = [4, 1], strides = [1, 1]} : vector<4x2xf32> to vector<4x1xf32>
    %c1_25 = arith.constant 1 : index
    %c0_26 = arith.constant 0 : index
    %c0_27 = arith.constant 0 : index
    %36 = vector.load %arg1[%c1_25, %c0_26, %c0_27] : memref<2x4x256xf32, #tpu.memory_space<vmem>>, vector<1x4x256xf32>
    %37 = vector.shape_cast %36 : vector<1x4x256xf32> to vector<4x256xf32>
    %38 = vector.broadcast %35 : vector<4x1xf32> to vector<4x256xf32>
    %39 = arith.mulf %37, %38 : vector<4x256xf32>
    %c1_28 = arith.constant 1 : index
    %c0_29 = arith.constant 0 : index
    %c0_30 = arith.constant 0 : index
    %40 = vector.load %arg6[%c1_28, %c0_29, %c0_30] : memref<2x4x256xf32, #tpu.memory_space<vmem>>, vector<1x4x256xf32>
    %41 = vector.shape_cast %40 : vector<1x4x256xf32> to vector<4x256xf32>
    %42 = vector.shape_cast %39 : vector<4x256xf32> to vector<1x4x256xf32>
    tpu.vector_store %arg6[%c1_28, %c0_29, %c0_30], %42 {strides = array<i32>} : memref<2x4x256xf32, #tpu.memory_space<vmem>>, vector<1x4x256xf32>,
    return
  }
  func.func @transform_0(%arg0: i32) -> (i32, i32, i32) {
    %c0_i32 = arith.constant 0 : i32
    %c0_i32_0 = arith.constant 0 : i32
    %c0_i32_1 = arith.constant 0 : i32
    return %arg0, %c0_i32, %c0_i32_0 : i32, i32, i32
  }
  func.func @transform_1(%arg0: i32) -> (i32, i32) {
    %c0_i32 = arith.constant 0 : i32
    %c0_i32_0 = arith.constant 0 : i32
    %c0_i32_1 = arith.constant 0 : i32
    return %c0_i32, %c0_i32_0 : i32, i32
  }
  func.func @transform_2(%arg0: i32) -> (i32, i32) {
    %c0_i32 = arith.constant 0 : i32
    %c0_i32_0 = arith.constant 0 : i32
    %c0_i32_1 = arith.constant 0 : i32
    return %c0_i32, %c0_i32_0 : i32, i32
  }
  func.func @transform_3(%arg0: i32) -> (i32, i32) {
    %c0_i32 = arith.constant 0 : i32
    %c0_i32_0 = arith.constant 0 : i32
    %c0_i32_1 = arith.constant 0 : i32
    return %c0_i32, %c0_i32_0 : i32, i32
  }
  func.func @transform_4(%arg0: i32) -> (i32, i32) {
    %c0_i32 = arith.constant 0 : i32
    %c0_i32_0 = arith.constant 0 : i32
    %c0_i32_1 = arith.constant 0 : i32
    return %c0_i32, %c0_i32_0 : i32, i32
  }
  func.func @transform_5(%arg0: i32) -> (i32, i32, i32) {
    %c0_i32 = arith.constant 0 : i32
    %c0_i32_0 = arith.constant 0 : i32
    %c0_i32_1 = arith.constant 0 : i32
    return %arg0, %c0_i32, %c0_i32_0 : i32, i32, i32
  }
}

</mosaic_0001>

<bundles_post_ra>
// kernel: tpu_custom_call.1
= control target key start
LH: loop header
LB: loop body
LE: loop exit
PB: predicated region body
PF: predicated region fallthrough
CT: control target
= control target key end

     0   :  { %10 = vsyncpa [#allocation3], 0  ;;  %s697_s0 = inlined_call_operand.hbm [shape: f32[2,4,256], index: 0, kind: input, shape index: {}]   ;;  %s698_s1 = inlined_call_operand.vmem [shape: f32[4,4], index: 1, kind: input, shape index: {}]   ;;  %s699_s2 = inlined_call_operand.vmem [shape: f32[4,1], index: 2, kind: input, shape index: {}]   ;;  %s700_s3 = inlined_call_operand.vmem [shape: f32[4,4], index: 3, kind: input, shape index: {}]   ;;  %s701_s4 = inlined_call_operand.vmem [shape: f32[4,1], index: 4, kind: input, shape index: {}]   ;;  %s702_s5 = inlined_call_operand.hbm [shape: f32[2,4,256], index: 5, kind: output, shape index: {}]  }
   0x1   :  { %11 = vsyncpa [#allocation4], 0  ;;  %s602_s18 = smov [#allocation2]   ;;  %s554_s22 = scalar_lea.hbm %s697_s0, 256 }
   0x2   :  { %s17_s19 = sshll.u32 %s602_s18, 4  ;;  %p555_p0 = scmp.ne.s32.totalorder %s697_s0, %s554_s22  ;;  %s18_s19 = int_to_ptr.vmem [resolvable:$true] %s17_s19 }
   0x3   :  { %p558_p1 = scmp.lt.u32.totalorder %s554_s22, %s697_s0 }
   0x5   :  { %p560_p2 = pnand %p558_p1, %p555_p0 }
   0x7   :  { %563 = shalt.err (!%p560_p2)
}
   0x8   :  { %s564_s27 = scalar_lea.vmem %s18_s19, 256  ;;  %p569_p4 = scmp.lt.s32.totalorder %s18_s19, %s18_s19 }
   0x9   :  { %p565_p3 = scmp.ne.s32.totalorder %s18_s19, %s564_s27  ;;  %p570_p5 = scmp.lt.s32.totalorder %s564_s27, %s564_s27 }
   0xb   :  { %p571_p6 = por %p570_p5, %p569_p4 }
   0xd   :  { %p572_p7 = pnand %p571_p6, %p565_p3 }
   0xf   :  { %575 = shalt.err (!%p572_p7)
}
  0x10   :  { %s603_s28 = smov 128   ;;  %s604_s29 = smov 8  }
  0x11   :  { %23 = dma.hbm_to_vmem [thread:$0]  %s697_s0, 256, %s18_s19, [#allocation3], %s603_s28, %s603_s28, %s604_s29  }
  0x12   :  { %598 = dma.done.wait [#allocation3], 256  }
  0x13   :  { %599 = vsyncadd [#allocation3], 4294967040  ;;  %v605_v0 = vmov 1.0|1.0   ;;  %v658_v1 = vld [vmem:[#allocation2 + $0x8] sm:$0xff]  ;;  %v660_v2 = vld [vmem:[#allocation2] sm:$0xff]  ;;  %v373_v36 = vlaneseq }
  0x14   :  { %517 = vmatprep.subr.bf16.mxu1 %v605_v0  ;;  %501 = vmatprep.subr.bf16.mxu0 %v605_v0  ;;  %v112_v3 = vcombine.high %v658_v1, %v658_v1  ;;  %v37_v4 = vcombine.high %v660_v2, %v660_v2  ;;  %v606_v5 = vmov 0.0   ;;  %vm607_vm0 = vmmov 0   ;;  %s609_s0 = smov 1   ;;  %v192_v13 = vld [vmem:[%s699_s2] sm:$0xf] }
  0x15   :  { %518 = vmatpush3.bf16.msra.mxu1 %v605_v0  ;;  %502 = vmatpush3.bf16.msra.mxu0 %v605_v0  ;;  %v608_v6 = vmov 0   ;;  %vm188_vm1 = vcmask 7168   ;;  %vm202_vm2 = vcmask 1043456   ;;  %v191_v17 = vld [vmem:[%s698_s1] sm:$0xf]  ;;  %vm198_vm3 = vcmask 31744  }
  0x16   :  { %519 = vmatprep.subr.bf16.mxu1 %v605_v0  ;;  %503 = vmatprep.subr.bf16.mxu0 %v605_v0  ;;  %v278_v18 = vld [vmem:[%s701_s4] sm:$0xf]  ;;  %v610_v25 = vmov 1   ;;  %v611_v34 = vmov 839922192   ;;  %v374_v38 = vshrl.u32 %v373_v36, 7 }
  0x17   :  { %178 = vmatprep.mubr.f32.mxu1 %v112_v3  ;;  %103 = vmatprep.mubr.f32.mxu0 %v37_v4  ;;  %v277_v24 = vld [vmem:[%s700_s3] sm:$0xf]  ;;  %v371_v35 = vunpack.c.l.s4 %v611_v34  ;;  %s612_s1 = smov [#allocation5]  }
  0x18   :  { %544 = vset.pattern.permute.xlu0 %v608_v6  ;;  %545 = vset.pattern.permute.xlu1 %v608_v6  ;;  %s400_s3 = sshll.u32 %s612_s1, 4  ;;  %s401_s3 = int_to_ptr.vmem [resolvable:$true] %s400_s3 }
  0x19   :  { %520 = vmatpush3.bf16.msra.mxu1 %v605_v0  ;;  %504 = vmatpush3.bf16.msra.mxu0 %v605_v0  ;;  %v372_v37 = vunpack.c.0.s8 %v371_v35  ;;  %s576_s4 = scalar_lea.vmem %s401_s3, 256  ;;  %p581_p9 = scmp.lt.s32.totalorder %s401_s3, %s401_s3 }
  0x1a   :  { %521 = vmatprep.subr.bf16.mxu1 %v605_v0  ;;  %505 = vmatprep.subr.bf16.mxu0 %v605_v0  ;;  %p577_p8 = scmp.ne.s32.totalorder %s401_s3, %s576_s4  ;;  %p582_p10 = scmp.lt.s32.totalorder %s576_s4, %s576_s4 }
  0x1b   :  { %281 = vperm.xlu1 %545, %v278_v18   ;;  %v375_v39 = vsub.s32 %v372_v37, %v374_v38 }
  0x1c   :  { %p583_p11 = por %p582_p10, %p581_p9 }
  0x1d   :  { %522 = vmatpush3.bf16.msra.mxu1 %v605_v0  ;;  %506 = vmatpush3.bf16.msra.mxu0 %v605_v0 }
  0x1e   :  { %523 = vmatprep.subr.bf16.mxu1 %v605_v0  ;;  %507 = vmatprep.subr.bf16.mxu0 %v605_v0  ;;  %p584_p12 = pnand %p583_p11, %p577_p8 }
  0x21   :  { %524 = vmatpush3.bf16.msra.mxu1 %v605_v0  ;;  %508 = vmatpush3.bf16.msra.mxu0 %v605_v0 }
  0x22   :  { %525 = vmatprep.subr.bf16.mxu1 %v605_v0  ;;  %509 = vmatprep.subr.bf16.mxu0 %v605_v0 }
  0x25   :  { %526 = vmatpush3.bf16.msra.mxu1 %v605_v0  ;;  %510 = vmatpush3.bf16.msra.mxu0 %v605_v0 }
  0x26   :  { %527 = vmatprep.subr.bf16.mxu1 %v605_v0  ;;  %511 = vmatprep.subr.bf16.mxu0 %v605_v0 }
  0x29   :  { %528 = vmatpush3.bf16.msra.mxu1 %v605_v0  ;;  %512 = vmatpush3.bf16.msra.mxu0 %v605_v0 }
  0x2a   :  { %529 = vmatprep.subr.bf16.mxu1 %v605_v0  ;;  %513 = vmatprep.subr.bf16.mxu0 %v605_v0 }
  0x2d   :  { %530 = vmatpush3.bf16.msra.mxu1 %v605_v0  ;;  %514 = vmatpush3.bf16.msra.mxu0 %v605_v0 }
  0x2e   :  { %531 = vmatprep.subr.bf16.mxu1 %v605_v0  ;;  %515 = vmatprep.subr.bf16.mxu0 %v605_v0 }
  0x31   :  { %532 = vmatpush3.bf16.msra.mxu1 %v605_v0  ;;  %516 = vmatpush3.bf16.msra.mxu0 %v605_v0 }
  0x32   :  { %491 = vmatprep.subr.mxu0 %v606_v5  ;;  %496 = vmatprep.subr.mxu1 %v606_v5 }
  0x34   :  { %179 = vmatmul.mubr.f32.vlgmr.msra.gmra.mrb[0].mxu1 %v658_v1  ;;  %104 = vmatmul.mubr.f32.vlgmr.msra.gmra.mrb[0].mxu0 %v660_v2 }
  0x35   :  { %493 = vmatprep.mubr.msk.f32.mxu0 %vm607_vm0, %v606_v5  ;;  %498 = vmatprep.mubr.msk.f32.mxu1 %vm607_vm0, %v606_v5 }
  0x9a   :  { %v282_v26 = vpop.permute.xlu1 %281 }
 0x107   :  { %v484_v7 = vpop.f32.mrb[0].mxu1  ;;  %v449_v9 = vpop.f32.mrb[0].mxu0 }
 0x108   :  { %v485_v8 = vpop.f32.mrb[1].mxu1  ;;  %v450_v11 = vpop.f32.mrb[1].mxu0 }
 0x109   :  { %v486_v10 = vadd.f32 %v485_v8, %v484_v7  ;;  %v451_v12 = vadd.f32 %v450_v11, %v449_v9 }
 0x10b   :  { %185 = vrot.lane.b32.xlu0 %v486_v10, %s609_s0 }
 0x10f   :  { %195 = vperm.xlu0 %544, %v192_v13  }
 0x113   :  { %547 = vset.pattern.permute.xlu0 %v610_v25 }
 0x17d   :  { %v186_v14 = vpop.permute.xlu0 %185 }
 0x17e   :  { %v189_v15 = vsel %vm188_vm1, %v451_v12, %v186_v14 }
 0x17f   :  { %v190_v16 = vmul.f32 0.00390625, %v189_v15 }
 0x181   :  { %492 = vmatpush3.msk.msra.mxu0 %vm202_vm2, %v190_v16 }
 0x182   :  { %494 = vmatmul.mubr.msk.f32.vlgmr.msra.gmra.mrb[2].mxu0 %vm198_vm3, %v191_v17 }
 0x18e   :  { %v196_v19 = vpop.permute.xlu0 %195 }
 0x255   :  { %v272_v20 = vpop.f32.mrb[2].mxu0 }
 0x256   :  { %v273_v21 = vadd.f32 %v272_v20, %v196_v19  ;;  %v495_v22 = vpop.f32.mrb[3].mxu0 }
 0x258   :  { %v276_v23 = vmax.f32 %v273_v21, 0.0 }
 0x25a   :  { %497 = vmatpush3.msk.msra.mxu1 %vm202_vm2, %v276_v23 }
 0x25b   :  { %499 = vmatmul.mubr.msk.f32.vlgmr.msra.gmra.mrb[2].mxu1 %vm198_vm3, %v277_v24 }
 0x32e   :  { %v356_v27 = vpop.f32.mrb[2].mxu1 }
 0x32f   :  { %v357_v28 = vadd.f32 %v356_v27, %v282_v26  ;;  %v500_v29 = vpop.f32.mrb[3].mxu1 }
 0x331   :  { %v416_v30 = vmul.f32 -1.442695, %v357_v28 }
 0x333   :  { %550 = vpow2.f32 %v416_v30 }
 0x33d   :  { %v551_v31 = vpop.eup %550 }
 0x33e   :  { %v363_v32 = vadd.f32 1.0, %v551_v31 }
 0x340   :  { %552 = vrcp.f32 %v363_v32 }
 0x34a   :  { %v553_v33 = vpop.eup %552 }
 0x34b   :  { %368 = vperm.xlu1 %545, %v553_v33  }
 0x34f   :  { %546 = vset.pattern.permute.xlu1 %v610_v25 }
 0x350   :  { %382 = vperm.xlu1 %546, %v553_v33  }
 0x3ca   :  { %v369_v40 = vpop.permute.xlu1 %368 }
 0x3cb   :  { %v376_v41 = vrot.slane %v369_v40, %v375_v39 }
 0x3cd   :  { %v378_v42 = vmul.f32 %v376_v41, %v660_v2 }
 0x3cf   :  { %379 = vst [vmem:[#allocation5] sm:$0xff] %v378_v42  ;;  %v383_v43 = vpop.permute.xlu1 %382 }
 0x3d0   :  { %v390_v44 = vrot.slane %v383_v43, %v375_v39 }
 0x3d2   :  { %v392_v45 = vmul.f32 %v390_v44, %v658_v1 }
 0x3d4   :  { %394 = vst [vmem:[#allocation5 + $0x8] sm:$0xff] %v392_v45 }
 0x3d5   :  { %587 = shalt.err (!%p584_p12)
}
 0x3d6   :  { %s588_s16 = scalar_lea.hbm %s702_s5, 256 }
 0x3d7   :  { %p589_p13 = scmp.ne.s32.totalorder %s702_s5, %s588_s16  ;;  %p592_p0 = scmp.lt.u32.totalorder %s588_s16, %s702_s5 }
 0x3d9   :  { %p594_p1 = pnand %p592_p0, %p589_p13 }
 0x3db   :  { %597 = shalt.err (!%p594_p1)
}
 0x3dc   :  { %406 = dma.vmem_to_hbm [thread:$0]  %s401_s3, 256, %s702_s5, [#allocation4], %s603_s28, %s603_s28, %s604_s29  }
 0x3dd   :  { %600 = dma.done.wait [#allocation4], 256  }
 0x3de   :  { %601 = vsyncadd [#allocation4], 4294967040 }
 0x3df   :  { %410 = vsyncpa [#allocation3], 1 }
 0x3e0   :  { %411 = vsyncpa [#allocation4], 1 }

</bundles_post_ra>
